<compile_context>
chip_gen: v5e
topology: v5e:2x2
jax: 0.10.0
libtpu: 0.0.40
codegen_flags: <defaults>
</compile_context>

<pallas_src>
import functools

import jax
import jax.numpy as jnp
from jax.experimental import pallas as pl
from jax.experimental.pallas import tpu as pltpu


def _vgae_kernel(adj_ref, x_ref, w1_ref, w23_ref, bias_ref, out_ref):
    """One graph per grid step.

    out = A_hat @ (relu(A_hat @ (x @ W1) + b1) @ [W2|W3]) + [b2|b3]
    """
    adj = adj_ref[...]                    # [N, N]
    x = x_ref[...]                        # [N, Cin]
    hidden = w1_ref.shape[1]              # static

    # gcn_shared: h = relu( A_hat @ (x @ W1) + b1 )
    h = jnp.dot(x, w1_ref[...], preferred_element_type=jnp.float32)
    h = jnp.dot(adj, h, preferred_element_type=jnp.float32) + bias_ref[:, :hidden]
    h = jnp.maximum(h, 0.0)

    # fused gcn_mu / gcn_logvar: z = A_hat @ (h @ [W2|W3]) + [b2|b3]
    z = jnp.dot(h, w23_ref[...], preferred_element_type=jnp.float32)
    z = jnp.dot(adj, z, preferred_element_type=jnp.float32) + bias_ref[:, hidden:]

    out_ref[...] = z.astype(out_ref.dtype)


def variational_gcn_encoder(x, adj_hat, params):
    """Fused 3-layer GCN encoder over a batch of graphs.

    x:       [B, N, Cin]
    adj_hat: [B, N, N]
    returns (mu, logvar), each [B, N, out_ch]
    """
    B, N, cin = x.shape
    hidden = params["w1"].shape[1]
    out_ch = params["w2"].shape[1]

    # Fuse mu/logvar weights and all biases in the wrapper -> fewer, wider DMAs
    # and one wide second-layer matmul.
    w23 = jnp.concatenate([params["w2"], params["w3"]], axis=1)            # [H, 2*out]
    bias_all = jnp.concatenate(
        [params["b1"], params["b2"], params["b3"]], axis=1)                # [1, H+2*out]

    packed = pl.pallas_call(
        _vgae_kernel,
        out_shape=jax.ShapeDtypeStruct((B, N, 2 * out_ch), jnp.float32),
        grid=(B,),
        in_specs=[
            # Per-graph inputs: one graph per grid step (leading dim squeezed).
            pl.BlockSpec((None, N, N), lambda b: (b, 0, 0)),
            pl.BlockSpec((None, N, cin), lambda b: (b, 0, 0)),
            # Shared weights / biases: constant block index -> stay VMEM-resident
            # across the whole batch grid.
            pl.BlockSpec((cin, hidden), lambda b: (0, 0)),
            pl.BlockSpec((hidden, 2 * out_ch), lambda b: (0, 0)),
            pl.BlockSpec((1, hidden + 2 * out_ch), lambda b: (0, 0)),
        ],
        # Single packed, lane-denser output (mu || logvar); split outside.
        out_specs=pl.BlockSpec((None, N, 2 * out_ch), lambda b: (b, 0, 0)),
        compiler_params=pltpu.CompilerParams(
            dimension_semantics=("parallel",)),
    )(adj_hat, x, params["w1"], w23, bias_all)

    return packed[..., :out_ch], packed[..., out_ch:]


def gcn_normalized_adjacency(edge_index, num_nodes, edge_weight=None):
    """Dense A_hat = D^-1/2 (A + I) D^-1/2, PyG GCNConv convention.

    edge_index[0] = source nodes, edge_index[1] = target nodes;
    messages flow source -> target, so A[target, source] = weight.
    """
    src = edge_index[0]
    dst = edge_index[1]
    if edge_weight is None:
        edge_weight = jnp.ones(src.shape[0], dtype=jnp.float32)
    A = jnp.zeros((num_nodes, num_nodes), jnp.float32).at[dst, src].add(edge_weight)
    A = A + jnp.eye(num_nodes, dtype=jnp.float32)          # add_self_loops, fill=1.0
    deg = A.sum(axis=1)
    dinv = jnp.where(deg > 0.0, 1.0 / jnp.sqrt(deg), 0.0)
    return dinv[:, None] * A * dinv[None, :]


def init_params(key, in_channels, hidden_channels, out_channels):
    """Deterministic glorot-uniform weights, zero biases (shapes match GCNConv)."""
    def glorot(k, fan_in, fan_out):
        limit = jnp.sqrt(6.0 / (fan_in + fan_out))
        return jax.random.uniform(k, (fan_in, fan_out), jnp.float32, -limit, limit)

    k1, k2, k3 = jax.random.split(key, 3)
    return {
        "w1": glorot(k1, in_channels, hidden_channels),
        "b1": jnp.zeros((1, hidden_channels), jnp.float32),
        "w2": glorot(k2, hidden_channels, out_channels),
        "b2": jnp.zeros((1, out_channels), jnp.float32),
        "w3": glorot(k3, hidden_channels, out_channels),
        "b3": jnp.zeros((1, out_channels), jnp.float32),
    }


def reference_forward(x, adj_hat, p):
    """Pure-JAX reference of the PyTorch forward (batched) for a sanity check."""
    h = jax.nn.relu(adj_hat @ (x @ p["w1"]) + p["b1"])
    mu = adj_hat @ (h @ p["w2"]) + p["b2"]
    logvar = adj_hat @ (h @ p["w3"]) + p["b3"]
    return mu, logvar


if __name__ == "__main__":
    key = jax.random.PRNGKey(0)
    k_x, k_e, k_w, k_p = jax.random.split(key, 4)

    # Small synthetic batch of graphs: B=4 graphs, 16 nodes, 8-dim features,
    # 40 directed edges per graph.
    batch = 4
    num_nodes = 16
    in_channels, hidden_channels, out_channels = 8, 32, 16
    num_edges = 40

    x = jax.random.normal(k_x, (batch, num_nodes, in_channels), jnp.float32)
    edge_index = jax.random.randint(k_e, (batch, 2, num_edges), 0, num_nodes, jnp.int32)
    edge_attr = jax.random.uniform(k_w, (batch, num_edges), jnp.float32, 0.5, 1.5)

    params = init_params(k_p, in_channels, hidden_channels, out_channels)

    build_adj = jax.vmap(
        functools.partial(gcn_normalized_adjacency, num_nodes=num_nodes))
    adj_hat = build_adj(edge_index, edge_weight=edge_attr)     # [B, N, N]

    mu, logvar = variational_gcn_encoder(x, adj_hat, params)
    mu, logvar = jax.block_until_ready((mu, logvar))

    mu_ref, lv_ref = reference_forward(x, adj_hat, params)
    assert jnp.allclose(mu, mu_ref, atol=1e-4, rtol=1e-4)
    assert jnp.allclose(logvar, lv_ref, atol=1e-4, rtol=1e-4)

    print("KERNEL_OK")
</pallas_src>

<mosaic_0001>
module attributes {stable_mosaic.version = 11 : i64} {
  func.func @_vgae_kernel(%arg0: i32, %arg1: memref<1x16x16xf32, #tpu.memory_space<vmem>>, %arg2: memref<1x16x8xf32, #tpu.memory_space<vmem>>, %arg3: memref<8x32xf32, #tpu.memory_space<vmem>>, %arg4: memref<32x32xf32, #tpu.memory_space<vmem>>, %arg5: memref<1x64xf32, #tpu.memory_space<vmem>>, %arg6: memref<1x16x32xf32, #tpu.memory_space<vmem>>) attributes {dimension_semantics = [#tpu.dimension_semantics<parallel>], iteration_bounds = array<i64: 4>, scalar_prefetch = 0 : i64, scratch_operands = 0 : i64, tpu.core_type = #tpu.core_type<tc>, window_params = [{transform_indices = @transform_0, window_bounds = array<i64: 1, 16, 16>}, {transform_indices = @transform_1, window_bounds = array<i64: 1, 16, 8>}, {pipeline_mode = #tpu.pipeline_mode<synchronous>, transform_indices = @transform_2, window_bounds = array<i64: 8, 32>}, {pipeline_mode = #tpu.pipeline_mode<synchronous>, transform_indices = @transform_3, window_bounds = array<i64: 32, 32>}, {pipeline_mode = #tpu.pipeline_mode<synchronous>, transform_indices = @transform_4, window_bounds = array<i64: 1, 64>}, {transform_indices = @transform_5, window_bounds = array<i64: 1, 16, 32>}]} {
    %c0 = arith.constant 0 : index
    %c0_0 = arith.constant 0 : index
    %c0_1 = arith.constant 0 : index
    %0 = vector.load %arg1[%c0, %c0_0, %c0_1] : memref<1x16x16xf32, #tpu.memory_space<vmem>>, vector<1x16x16xf32>
    %1 = vector.shape_cast %0 : vector<1x16x16xf32> to vector<16x16xf32>
    %c0_2 = arith.constant 0 : index
    %c0_3 = arith.constant 0 : index
    %c0_4 = arith.constant 0 : index
    %2 = vector.load %arg2[%c0_2, %c0_3, %c0_4] : memref<1x16x8xf32, #tpu.memory_space<vmem>>, vector<1x16x8xf32>
    %3 = vector.shape_cast %2 : vector<1x16x8xf32> to vector<16x8xf32>
    %c0_5 = arith.constant 0 : index
    %c0_6 = arith.constant 0 : index
    %4 = vector.load %arg3[%c0_5, %c0_6] : memref<8x32xf32, #tpu.memory_space<vmem>>, vector<8x32xf32>
    %cst = arith.constant dense<0.000000e+00> : vector<16x32xf32>
    %5 = tpu.matmul %3, %4, %cst {dimension_numbers = #tpu.dot_dimension_numbers<[1], [0], [0], [1], [0, 0, 1, 1], [], []>} : vector<16x8xf32>, vector<8x32xf32>, vector<16x32xf32> -> vector<16x32xf32>
    %cst_7 = arith.constant dense<0.000000e+00> : vector<16x32xf32>
    %6 = tpu.matmul %1, %5, %cst_7 {dimension_numbers = #tpu.dot_dimension_numbers<[1], [0], [0], [1], [0, 0, 1, 1], [], []>} : vector<16x16xf32>, vector<16x32xf32>, vector<16x32xf32> -> vector<16x32xf32>
    %c0_8 = arith.constant 0 : index
    %c0_9 = arith.constant 0 : index
    %7 = vector.load %arg5[%c0_8, %c0_9] : memref<1x64xf32, #tpu.memory_space<vmem>>, vector<1x32xf32>
    %8 = vector.broadcast %7 : vector<1x32xf32> to vector<16x32xf32>
    %9 = arith.addf %6, %8 : vector<16x32xf32>
    %cst_10 = arith.constant 0.000000e+00 : f32
    %10 = vector.broadcast %cst_10 : f32 to vector<16x32xf32>
    %11 = arith.maximumf %9, %10 : vector<16x32xf32>
    %c0_11 = arith.constant 0 : index
    %c0_12 = arith.constant 0 : index
    %12 = vector.load %arg4[%c0_11, %c0_12] : memref<32x32xf32, #tpu.memory_space<vmem>>, vector<32x32xf32>
    %cst_13 = arith.constant dense<0.000000e+00> : vector<16x32xf32>
    %13 = tpu.matmul %11, %12, %cst_13 {dimension_numbers = #tpu.dot_dimension_numbers<[1], [0], [0], [1], [0, 0, 1, 1], [], []>} : vector<16x32xf32>, vector<32x32xf32>, vector<16x32xf32> -> vector<16x32xf32>
    %cst_14 = arith.constant dense<0.000000e+00> : vector<16x32xf32>
    %14 = tpu.matmul %1, %13, %cst_14 {dimension_numbers = #tpu.dot_dimension_numbers<[1], [0], [0], [1], [0, 0, 1, 1], [], []>} : vector<16x16xf32>, vector<16x32xf32>, vector<16x32xf32> -> vector<16x32xf32>
    %c0_15 = arith.constant 0 : index
    %c32 = arith.constant 32 : index
    %15 = vector.load %arg5[%c0_15, %c32] : memref<1x64xf32, #tpu.memory_space<vmem>>, vector<1x32xf32>
    %16 = vector.broadcast %15 : vector<1x32xf32> to vector<16x32xf32>
    %17 = arith.addf %14, %16 : vector<16x32xf32>
    %c0_16 = arith.constant 0 : index
    %c0_17 = arith.constant 0 : index
    %c0_18 = arith.constant 0 : index
    %18 = vector.load %arg6[%c0_16, %c0_17, %c0_18] : memref<1x16x32xf32, #tpu.memory_space<vmem>>, vector<1x16x32xf32>
    %19 = vector.shape_cast %18 : vector<1x16x32xf32> to vector<16x32xf32>
    %20 = vector.shape_cast %17 : vector<16x32xf32> to vector<1x16x32xf32>
    tpu.vector_store %arg6[%c0_16, %c0_17, %c0_18], %20 {strides = array<i32>} : memref<1x16x32xf32, #tpu.memory_space<vmem>>, vector<1x16x32xf32>,
    return
  }
  func.func @transform_0(%arg0: i32) -> (i32, i32, i32) {
    %c0_i32 = arith.constant 0 : i32
    %c0_i32_0 = arith.constant 0 : i32
    %c0_i32_1 = arith.constant 0 : i32
    return %arg0, %c0_i32, %c0_i32_0 : i32, i32, i32
  }
  func.func @transform_1(%arg0: i32) -> (i32, i32, i32) {
    %c0_i32 = arith.constant 0 : i32
    %c0_i32_0 = arith.constant 0 : i32
    %c0_i32_1 = arith.constant 0 : i32
    return %arg0, %c0_i32, %c0_i32_0 : i32, i32, i32
  }
  func.func @transform_2(%arg0: i32) -> (i32, i32) {
    %c0_i32 = arith.constant 0 : i32
    %c0_i32_0 = arith.constant 0 : i32
    %c0_i32_1 = arith.constant 0 : i32
    return %c0_i32, %c0_i32_0 : i32, i32
  }
  func.func @transform_3(%arg0: i32) -> (i32, i32) {
    %c0_i32 = arith.constant 0 : i32
    %c0_i32_0 = arith.constant 0 : i32
    %c0_i32_1 = arith.constant 0 : i32
    return %c0_i32, %c0_i32_0 : i32, i32
  }
  func.func @transform_4(%arg0: i32) -> (i32, i32) {
    %c0_i32 = arith.constant 0 : i32
    %c0_i32_0 = arith.constant 0 : i32
    %c0_i32_1 = arith.constant 0 : i32
    return %c0_i32, %c0_i32_0 : i32, i32
  }
  func.func @transform_5(%arg0: i32) -> (i32, i32, i32) {
    %c0_i32 = arith.constant 0 : i32
    %c0_i32_0 = arith.constant 0 : i32
    %c0_i32_1 = arith.constant 0 : i32
    return %arg0, %c0_i32, %c0_i32_0 : i32, i32, i32
  }
}

</mosaic_0001>

<bundles_post_ra>
// kernel: tpu_custom_call.1
= control target key start
LH: loop header
LB: loop body
LE: loop exit
PB: predicated region body
PF: predicated region fallthrough
CT: control target
= control target key end

     0   :  { %10 = vsyncpa [#allocation3], 0  ;;  %s821_s0 = inlined_call_operand.vmem [shape: f32[4,16,16], index: 0, kind: input, shape index: {}]   ;;  %s822_s1 = inlined_call_operand.vmem [shape: f32[4,16,8], index: 1, kind: input, shape index: {}]   ;;  %s823_s2 = inlined_call_operand.hbm [shape: f32[8,32], index: 2, kind: input, shape index: {}]   ;;  %s824_s3 = inlined_call_operand.vmem [shape: f32[32,32], index: 3, kind: input, shape index: {}]   ;;  %s825_s4 = inlined_call_operand.vmem [shape: f32[1,64], index: 4, kind: input, shape index: {}]   ;;  %s826_s5 = inlined_call_operand.hbm [shape: f32[4,16,32], index: 5, kind: output, shape index: {}]  }
   0x1   :  { %11 = vsyncpa [#allocation4], 0 }
   0x2   :  { %13 = vsyncpa [#allocation4 + $0x1], 0  ;;  %s706_s18 = smov 0   ;;  %s708_s19 = smov 0  }
   0x3   :  { %s710_s20 = smov 0   ;;  %s712_s21 = smov 0  }
   0x4 LB: > { %s727_s22 = sadd.s32 4294967295, %s670_s21   ;;  %s493_s23 = sadd.s32 4294967294, %s670_s21   ;;  %s670_s21 = sphi %s712_s21, %s832_s21   ;;  %s666_s20 = sphi %s710_s20, %s831_s20   ;;  %s662_s19 = sphi %s708_s19, %s830_s19   ;;  %s658_s18 = sphi %s706_s18, %s829_s18  }
   0x5   : > { %s731_s24 = sadd.s32 1, %s670_s21   ;;  %s141_s25 = sadd.s32 1, %s666_s20 }
   0x6   : > { %s138_s26 = ssub.s32 %s670_s21, %s731_s24  ;;  %p151_p0 = scmp.ne.s32.totalorder %s666_s20, %s662_s19 }
   0x7   : > { %p139_p1 = scmp.eq.s32.totalorder %s138_s26, 0  ;;  %p152_p2 = scmp.eq.s32.totalorder %s727_s22, 3 }
   0x8   : > { %p157_p3 = scmp.ne.s32.totalorder %s662_s19, %s658_s18  ;;  %p158_p4 = scmp.eq.s32.totalorder %s493_s23, 3 }
   0x9   : > { %s742_s27 = scalar_select %p139_p1, %s666_s20, %s141_s25  }
   0xa   : > { %p744_p5 = por %p152_p2, %p151_p0  ;;  %p748_p6 = por %p158_p4, %p157_p3 }
   0xb   : > { %p494_p7 = scmp.ge.s32.totalorder %s670_s21, 1  ;;  %p165_p8 = scmp.lt.s32.totalorder %s670_s21, 5 }
   0xc   : > { %p534_p9 = scmp.eq.s32.totalorder %s727_s22, 0  ;;  %s177_s7 = sshll.u32 %s823_s2, 4  ;;  %s178_s7 = int_to_ptr.hbm [resolvable:$true] %s177_s7 }
   0xd   : > { %p166_p10 = pnand %p494_p7, %p165_p8  ;;  %s672_s8 = smov [#allocation2]  }
   0xe   : > { %s179_s9 = sshll.u32 %s672_s8, 4  ;;  %s180_s9 = int_to_ptr.vmem [resolvable:$true] %s179_s9 }
   0xf   : > { %p526_p11 = pneg %p166_p10  ;;  %214 = sbr.rel (%p166_p10) target bundleno = 584 (0x248), region = 40 }
  0x11   : > { %p527_p12 = pnand %p534_p9, %p526_p11 }
  0x13   : > { %529 = dma.hbm_to_vmem [thread:$0]  (!%p527_p12), %s178_s7, 128, %s180_s9, [#allocation3]  }
  0x14   : > { %649 = dma.done.wait (%p534_p9), [#allocation3], 128  }
  0x15   : > { %651 = vsyncadd (%p534_p9), [#allocation3], 4294967168  ;;  %p248_p13 = scmp.lt.s32.totalorder %s727_s22, 3  ;;  %vm263_vm0 = vcmask 64512   ;;  %v262_v0 = vld [vmem:[#allocation2] sm:$0xff]  ;;  %v332_v3 = vld [vmem:[%s824_s3 + $0x18] sm:$0xff] }
  0x16   : > { %285 = vmatpush.msra.mxu0 %v262_v0  ;;  %352 = vmatpush.msra.mxu2 %v332_v3  ;;  %vm297_vm1 = vcmask 130048   ;;  %v331_v8 = vld [vmem:[%s824_s3 + $0x10] sm:$0xff]  ;;  %v330_v9 = vld [vmem:[%s824_s3 + $0x8] sm:$0xff]  ;;  %v329_v10 = vld [vmem:[%s824_s3] sm:$0xff]  ;;  %vm333_vm2 = vcmask 261120   ;;  %s673_s12 = smov 96  }
  0x17   : > { %s249_s10 = scalar_select %p248_p13, %s727_s22, 3  ;;  %v573_v11 = vld [vmem:[%s825_s4] ss:$0 sm:$0xff] }
  0x18   : > { %353 = vmatpush.msra.mxu2 %v331_v8  ;;  %363 = vrot.lane.b32.xlu0 %v573_v11, %s673_s12  ;;  %s245_s13 = sand.u32 1, %s662_s19   ;;  %s519_s15 = sshll.u32 %s727_s22, 4 }
  0x19   : > { %s517_s11 = sshll.u32 %s249_s10, 4  ;;  %s403_s23 = scalar_lea.hbm %s826_s5, %s519_s15 }
  0x1a   : > { %s257_s14 = scalar_lea.vmem %s822_s1, %s517_s11  ;;  %s252_s25 = scalar_lea.vmem %s821_s0, %s517_s11  ;;  %354 = vmatpush.msra.mxu2 %v330_v9 }
  0x1b   : > { %v260_v1 = vld [vmem:[%s257_s14] sm:$0xff]  ;;  %v261_v2 = vld [vmem:[%s257_s14 + $0x8] sm:$0xff]  ;;  %s499_s14 = sshll.u32 %s245_s13, 4  ;;  %s406_s30 = sshll.u32 %s403_s23, 4  ;;  %s407_s30 = int_to_ptr.hbm [resolvable:$true] %s406_s30 }
  0x1c   : > { %504 = vmatmul.msk.f32.vlgmr.msra.gmra.mxu0 %vm263_vm0, %v260_v1  ;;  %v258_v6 = vld [vmem:[%s252_s25] sm:$0xff]  ;;  %v259_v7 = vld [vmem:[%s252_s25 + $0x8] sm:$0xff]  ;;  %355 = vmatpush.msra.mxu2 %v329_v10  ;;  %s247_s25 = scalar_lea.vmem [#allocation5], %s499_s14  ;;  %s392_s6 = scalar_lea.sflag [#allocation4], %s245_s13 }
  0x1d   : > { %s404_s26 = sshll.u32 %s247_s25, 4  ;;  %s618_s22 = sshra.s32 %s407_s30, 4  ;;  %s405_s26 = int_to_ptr.vmem [resolvable:$true] %s404_s26  ;;  %s619_s22 = int_to_ptr.hbm [resolvable:$true] %s618_s22 }
  0x1e   : > { %s620_s7 = scalar_lea.hbm %s619_s22, 16  ;;  %s624_s10 = scalar_lea.hbm %s826_s5, 64 }
  0x1f   : > { %p621_p0 = scmp.ne.s32.totalorder %s619_s22, %s620_s7  ;;  %p625_p3 = scmp.lt.s32.totalorder %s619_s22, %s826_s5 }
  0x20   : > { %p626_p4 = scmp.lt.s32.totalorder %s624_s10, %s620_s7 }
  0x21   : > { %p622_p1 = pnand %p621_p0, %p744_p5 }
  0x22   : > { %p627_p7 = por %p626_p4, %p625_p3 }
  0x23   : > { %p623_p2 = pneg %p622_p1 }
  0x24   : > { %505 = vmatmul.msk.f32.gmra.mxu0 %vm263_vm0, %v261_v2 }
  0x25   : > { %p628_p8 = pnand %p627_p7, %p623_p2 }
  0x8a   : > { %v364_v20 = vpop.permute.xlu0 %363 }
  0x99   : > { %v287_v4 = vpop.f32.mrf.mxu0 }
  0xa1   : > { %v290_v5 = vpop.f32.mrf.mxu0 }
  0xa2   : > { %318 = vmatpush.msra.mxu1 %v290_v5 }
  0xa4   : > { %319 = vmatpush.msra.mxu1 %v287_v4 }
  0xa5   : > { %506 = vmatmul.msk.f32.vlgmr.msra.gmra.mxu1 %vm297_vm1, %v258_v6 }
  0xad   : > { %507 = vmatmul.msk.f32.gmra.mxu1 %vm297_vm1, %v259_v7 }
 0x122   : > { %v321_v12 = vpop.f32.mrf.mxu1 }
 0x123   : > { %v322_v13 = vadd.f32 %v573_v11, %v321_v12 }
 0x125   : > { %v327_v14 = vmax.f32 %v322_v13, 0.0 }
 0x127   : > { %508 = vmatmul.msk.f32.vlgmr.msra.gmra.mxu2 %vm333_vm2, %v327_v14 }
 0x12a   : > { %v324_v15 = vpop.f32.mrf.mxu1 }
 0x12b   : > { %v325_v16 = vadd.f32 %v573_v11, %v324_v15 }
 0x12d   : > { %v328_v17 = vmax.f32 %v325_v16, 0.0 }
 0x12f   : > { %509 = vmatmul.msk.f32.gmra.mxu2 %vm333_vm2, %v328_v17 }
 0x1aa   : > { %v357_v18 = vpop.f32.mrf.mxu2 }
 0x1b2   : > { %v360_v19 = vpop.f32.mrf.mxu2 }
 0x1b3   : > { %380 = vmatpush.msra.mxu3 %v360_v19 }
 0x1b5   : > { %381 = vmatpush.msra.mxu3 %v357_v18 }
 0x1b6   : > { %510 = vmatmul.msk.f32.vlgmr.msra.gmra.mxu3 %vm297_vm1, %v258_v6 }
 0x1be   : > { %511 = vmatmul.msk.f32.gmra.mxu3 %vm297_vm1, %v259_v7 }
 0x239   : > { %v383_v21 = vpop.f32.mrf.mxu3 }
 0x23a   : > { %v384_v22 = vadd.f32 %v383_v21, %v364_v20 }
 0x23c   : > { %389 = vst.msk [vmem:[%s247_s25] sm:$0xff] %vm333_vm2, %v384_v22 }
 0x241   : > { %v386_v23 = vpop.f32.mrf.mxu3 }
 0x242   : > { %v387_v24 = vadd.f32 %v386_v23, %v364_v20 }
 0x244   : > { %390 = vst.msk [vmem:[%s247_s25 + $0x8] sm:$0xff] %vm333_vm2, %v387_v24 }
 0x245   : > { %631 = shalt.err (!%p628_p8)
}
 0x246   : > { %s674_s13 = smov 128   ;;  %s675_s14 = smov 8  }
 0x247   : > { %524 = dma.vmem_to_hbm [thread:$0]  (%p744_p5), %s405_s26, 256, %s407_s30, %s392_s6, %s674_s13, %s674_s13, %s675_s14  }
 0x248 PF: > { %p536_p9 = scmp.ge.s32.totalorder %s670_s21, 2  ;;  %s421_s15 = sand.u32 1, %s658_s18  }
 0x249   : > { %s422_s16 = scalar_lea.sflag [#allocation4], %s421_s15 }
 0x24a   : > { %p531_p10 = pnand %p536_p9, %p748_p6 }
 0x24c   : > { %p532_p11 = pneg %p531_p10 }
 0x24e   : > { %653 = dma.done.wait (%p532_p11), %s422_s16, 256  }
 0x24f   : > { %655 = vsyncadd (%p532_p11), %s422_s16, 4294967040  ;;  %p16_p12 = scmp.ge.s32.totalorder %s731_s24, 6   ;;  %s829_s18 = smov %s662_s19 }
 0x250   : > { %s830_s19 = smov %s666_s20  ;;  %s831_s20 = smov %s742_s27 }
 0x251   : > { %s832_s21 = smov %s731_s24  ;;  %18 = sbr.rel (!%p16_p12) target bundleno = 4 (0x4), region = 83 }
 0x256   :  { %428 = vsyncpa [#allocation3], 1 }
 0x257   :  { %430 = vsyncpa [#allocation3 + $0x1], 1 }
 0x258   :  { %431 = vsyncpa [#allocation4], 1 }
 0x259   :  { %433 = vsyncpa [#allocation4 + $0x1], 1 }

</bundles_post_ra>
